<compile_context>
chip_gen: v5e
topology: v5e:2x2
jax: 0.10.0
libtpu: 0.0.40
codegen_flags: <defaults>
</compile_context>

<pallas_src>
import jax
import jax.numpy as jnp
from jax.experimental import pallas as pl
from jax.experimental.pallas import tpu as pltpu


# ----------------------------------------------------------------------------
# Pallas kernel: fused 2-layer GCN encoder (one graph per grid step)
# ----------------------------------------------------------------------------
def meta_encoder_kernel(a_ref, x_ref, w1_ref, b1_ref, w2_ref, b2_ref, o_ref):
    a = a_ref[...]                 # [N, N]      bf16 normalized adjacency
    x = x_ref[...]                 # [N, Fin_p]  bf16 node features
    w1 = w1_ref[...]               # [Fin_p, Hid_p] bf16
    w2 = w2_ref[...]               # [Hid_p, Out_p] bf16
    b1 = b1_ref[...]               # [1, Hid_p]  f32 (added post-accumulation)
    b2 = b2_ref[...]               # [1, Out_p]  f32

    # --- conv1: A_hat @ (x @ W1) + b1, then ReLU ------------------------------
    xw1 = jnp.dot(x, w1, preferred_element_type=jnp.float32)              # [N, Hid_p] f32
    h = jnp.dot(a, xw1.astype(jnp.bfloat16),
                preferred_element_type=jnp.float32) + b1                  # [N, Hid_p] f32
    h = jnp.maximum(h, 0.0).astype(jnp.bfloat16)

    # --- conv2: A_hat @ (h @ W2) + b2 -----------------------------------------
    hw2 = jnp.dot(h, w2, preferred_element_type=jnp.float32)              # [N, Out_p] f32
    out = jnp.dot(a, hw2.astype(jnp.bfloat16),
                  preferred_element_type=jnp.float32) + b2                # [N, Out_p] f32

    o_ref[...] = out.astype(o_ref.dtype)                                  # lane-dense store


# ----------------------------------------------------------------------------
# Wrapper: pad feature dims to 128 lanes, cast MXU operands to bf16, batch grid
# ----------------------------------------------------------------------------
def _round_up(v, m):
    return ((v + m - 1) // m) * m


def _pad_axis(arr, axis, target):
    cur = arr.shape[axis]
    if cur >= target:
        return arr
    pads = [(0, 0)] * arr.ndim
    pads[axis] = (0, target - cur)
    return jnp.pad(arr, pads)


def meta_encoder_pallas(a_hat, x, w1, b1, w2, b2):
    """a_hat: [B,N,N], x: [B,N,Fin], w1: [Fin,Hid], b1: [Hid], w2: [Hid,Fout], b2: [Fout]."""
    B, N, _ = a_hat.shape
    fin, hid = w1.shape
    fout = w2.shape[1]

    LANE = 128
    fin_p = _round_up(fin, LANE)
    hid_p = _round_up(hid, LANE)
    out_p = _round_up(fout, LANE)

    # Zero-pad feature dims (math unchanged; padded columns remain 0 through
    # relu and both matmuls, then get sliced off). Cast MXU operands to bf16
    # (halves DMA bytes, single-pass bf16 MXU); biases stay f32.
    a_bf = a_hat.astype(jnp.bfloat16)
    x_p = _pad_axis(x, 2, fin_p).astype(jnp.bfloat16)
    w1_p = _pad_axis(_pad_axis(w1, 0, fin_p), 1, hid_p).astype(jnp.bfloat16)
    w2_p = _pad_axis(_pad_axis(w2, 0, hid_p), 1, out_p).astype(jnp.bfloat16)
    b1_p = _pad_axis(b1.reshape(1, -1), 1, hid_p).astype(jnp.float32)
    b2_p = _pad_axis(b2.reshape(1, -1), 1, out_p).astype(jnp.float32)

    out = pl.pallas_call(
        meta_encoder_kernel,
        out_shape=jax.ShapeDtypeStruct((B, N, out_p), jnp.float32),
        grid=(B,),
        in_specs=[
            pl.BlockSpec((None, N, N), lambda b: (b, 0, 0)),       # A_hat  (per graph)
            pl.BlockSpec((None, N, fin_p), lambda b: (b, 0, 0)),   # x      (per graph)
            pl.BlockSpec((fin_p, hid_p), lambda b: (0, 0)),        # W1     (shared)
            pl.BlockSpec((1, hid_p), lambda b: (0, 0)),            # b1     (shared)
            pl.BlockSpec((hid_p, out_p), lambda b: (0, 0)),        # W2     (shared)
            pl.BlockSpec((1, out_p), lambda b: (0, 0)),            # b2     (shared)
        ],
        out_specs=pl.BlockSpec((None, N, out_p), lambda b: (b, 0, 0)),
        compiler_params=pltpu.CompilerParams(
            dimension_semantics=("parallel",),   # shard graphs across TCs on v7x
        ),
    )(a_bf, x_p, w1_p, b1_p, w2_p, b2_p)

    return out[..., :fout]


# ----------------------------------------------------------------------------
# Glue: GCN-normalized dense adjacency from edge_index (plain JAX)
# ----------------------------------------------------------------------------
def build_normalized_adjacency(edge_index, num_nodes):
    src = edge_index[0]
    dst = edge_index[1]
    a = jnp.zeros((num_nodes, num_nodes), jnp.float32)
    # scatter-ADD (PyG aggregation): duplicate edges accumulate their weights
    a = a.at[dst, src].add(1.0)
    # add self-loops only to nodes lacking one (add_remaining_self_loops semantics)
    idx = jnp.arange(num_nodes)
    diag = a[idx, idx]
    a = a.at[idx, idx].add(jnp.where(diag > 0.0, 0.0, 1.0))
    deg = a.sum(axis=1)
    deg_inv_sqrt = jnp.where(deg > 0, jax.lax.rsqrt(deg), 0.0)
    return deg_inv_sqrt[:, None] * a * deg_inv_sqrt[None, :]


# ----------------------------------------------------------------------------
# References (for sanity checking the kernel)
# ----------------------------------------------------------------------------
def meta_encoder_ref_f32(a_hat, x, w1, b1, w2, b2):
    h = jax.nn.relu(a_hat @ (x @ w1) + b1)
    return a_hat @ (h @ w2) + b2


def meta_encoder_ref_bf16(a_hat, x, w1, b1, w2, b2):
    bf = jnp.bfloat16
    a_b, x_b, w1_b, w2_b = a_hat.astype(bf), x.astype(bf), w1.astype(bf), w2.astype(bf)
    xw1 = jnp.dot(x_b, w1_b, preferred_element_type=jnp.float32)
    h = jnp.dot(a_b, xw1.astype(bf), preferred_element_type=jnp.float32) + b1
    h = jnp.maximum(h, 0.0).astype(bf)
    hw2 = jnp.dot(h, w2_b, preferred_element_type=jnp.float32)
    return jnp.dot(a_b, hw2.astype(bf), preferred_element_type=jnp.float32) + b2


if __name__ == "__main__":
    # Small shapes consistent with the module: B graphs, N nodes, in/out channels.
    B = 2
    N = 16
    IN_CHANNELS = 4
    OUT_CHANNELS = 16          # conv1 -> 2*OUT_CHANNELS hidden, conv2 -> OUT_CHANNELS
    HID = 2 * OUT_CHANNELS

    key = jax.random.PRNGKey(0)
    kx, kw1, kb1, kw2, kb2 = jax.random.split(key, 5)

    # Node features for B graphs
    x = jax.random.normal(kx, (B, N, IN_CHANNELS), jnp.float32)

    # B small directed graphs: ring + a few chords (different per graph)
    a_list = []
    for g in range(B):
        src = jnp.concatenate([jnp.arange(N), jnp.arange(0, N, 2)])
        dst = jnp.concatenate([(jnp.arange(N) + 1) % N,
                               (jnp.arange(0, N, 2) + 3 + g) % N])
        edge_index = jnp.stack([src, dst]).astype(jnp.int32)
        a_list.append(build_normalized_adjacency(edge_index, N))
    a_hat = jnp.stack(a_list)                                   # [B, N, N]

    # Deterministic "meta" weights, mimicking weights['encoder.conv1.weight'] etc.
    w1 = jax.random.normal(kw1, (IN_CHANNELS, HID), jnp.float32) * 0.3
    b1 = jax.random.normal(kb1, (HID,), jnp.float32) * 0.1
    w2 = jax.random.normal(kw2, (HID, OUT_CHANNELS), jnp.float32) * 0.3
    b2 = jax.random.normal(kb2, (OUT_CHANNELS,), jnp.float32) * 0.1

    out = meta_encoder_pallas(a_hat, x, w1, b1, w2, b2)
    out = jax.block_until_ready(out)

    ref_bf16 = jax.vmap(lambda a, xx: meta_encoder_ref_bf16(a, xx, w1, b1, w2, b2))(a_hat, x)
    ref_f32 = jax.vmap(lambda a, xx: meta_encoder_ref_f32(a, xx, w1, b1, w2, b2))(a_hat, x)

    assert out.shape == (B, N, OUT_CHANNELS)
    # tight vs. a reference using the same bf16 operand casts
    assert jnp.allclose(out, ref_bf16, atol=1e-2, rtol=1e-2)
    # loose vs. the full-f32 reference (bf16 MXU rounding)
    assert jnp.allclose(out, ref_f32, atol=7.5e-2, rtol=7.5e-2)

    print("KERNEL_OK")
</pallas_src>

<mosaic_0001>
module attributes {stable_mosaic.version = 11 : i64} {
  func.func @meta_encoder_kernel(%arg0: i32, %arg1: memref<1x16x16xbf16, #tpu.memory_space<vmem>>, %arg2: memref<1x16x128xbf16, #tpu.memory_space<vmem>>, %arg3: memref<128x128xbf16, #tpu.memory_space<vmem>>, %arg4: memref<1x128xf32, #tpu.memory_space<vmem>>, %arg5: memref<128x128xbf16, #tpu.memory_space<vmem>>, %arg6: memref<1x128xf32, #tpu.memory_space<vmem>>, %arg7: memref<1x16x128xf32, #tpu.memory_space<vmem>>) attributes {dimension_semantics = [#tpu.dimension_semantics<parallel>], iteration_bounds = array<i64: 2>, scalar_prefetch = 0 : i64, scratch_operands = 0 : i64, tpu.core_type = #tpu.core_type<tc>, window_params = [{transform_indices = @transform_0, window_bounds = array<i64: 1, 16, 16>}, {transform_indices = @transform_1, window_bounds = array<i64: 1, 16, 128>}, {pipeline_mode = #tpu.pipeline_mode<synchronous>, transform_indices = @transform_2, window_bounds = array<i64: 128, 128>}, {pipeline_mode = #tpu.pipeline_mode<synchronous>, transform_indices = @transform_3, window_bounds = array<i64: 1, 128>}, {pipeline_mode = #tpu.pipeline_mode<synchronous>, transform_indices = @transform_4, window_bounds = array<i64: 128, 128>}, {pipeline_mode = #tpu.pipeline_mode<synchronous>, transform_indices = @transform_5, window_bounds = array<i64: 1, 128>}, {transform_indices = @transform_6, window_bounds = array<i64: 1, 16, 128>}]} {
    %c0 = arith.constant 0 : index
    %c0_0 = arith.constant 0 : index
    %c0_1 = arith.constant 0 : index
    %0 = vector.load %arg1[%c0, %c0_0, %c0_1] : memref<1x16x16xbf16, #tpu.memory_space<vmem>>, vector<1x16x16xbf16>
    %1 = vector.shape_cast %0 : vector<1x16x16xbf16> to vector<16x16xbf16>
    %c0_2 = arith.constant 0 : index
    %c0_3 = arith.constant 0 : index
    %c0_4 = arith.constant 0 : index
    %2 = vector.load %arg2[%c0_2, %c0_3, %c0_4] : memref<1x16x128xbf16, #tpu.memory_space<vmem>>, vector<1x16x128xbf16>
    %3 = vector.shape_cast %2 : vector<1x16x128xbf16> to vector<16x128xbf16>
    %c0_5 = arith.constant 0 : index
    %c0_6 = arith.constant 0 : index
    %4 = vector.load %arg3[%c0_5, %c0_6] : memref<128x128xbf16, #tpu.memory_space<vmem>>, vector<128x128xbf16>
    %c0_7 = arith.constant 0 : index
    %c0_8 = arith.constant 0 : index
    %5 = vector.load %arg5[%c0_7, %c0_8] : memref<128x128xbf16, #tpu.memory_space<vmem>>, vector<128x128xbf16>
    %c0_9 = arith.constant 0 : index
    %c0_10 = arith.constant 0 : index
    %6 = vector.load %arg4[%c0_9, %c0_10] : memref<1x128xf32, #tpu.memory_space<vmem>>, vector<1x128xf32>
    %c0_11 = arith.constant 0 : index
    %c0_12 = arith.constant 0 : index
    %7 = vector.load %arg6[%c0_11, %c0_12] : memref<1x128xf32, #tpu.memory_space<vmem>>, vector<1x128xf32>
    %cst = arith.constant dense<0.000000e+00> : vector<16x128xf32>
    %8 = tpu.matmul %3, %4, %cst {dimension_numbers = #tpu.dot_dimension_numbers<[1], [0], [0], [1], [0, 0, 1, 1], [], []>} : vector<16x128xbf16>, vector<128x128xbf16>, vector<16x128xf32> -> vector<16x128xf32>
    %9 = arith.truncf %8 : vector<16x128xf32> to vector<16x128xbf16>
    %cst_13 = arith.constant dense<0.000000e+00> : vector<16x128xf32>
    %10 = tpu.matmul %1, %9, %cst_13 {dimension_numbers = #tpu.dot_dimension_numbers<[1], [0], [0], [1], [0, 0, 1, 1], [], []>} : vector<16x16xbf16>, vector<16x128xbf16>, vector<16x128xf32> -> vector<16x128xf32>
    %11 = vector.broadcast %6 : vector<1x128xf32> to vector<16x128xf32>
    %12 = arith.addf %10, %11 : vector<16x128xf32>
    %cst_14 = arith.constant 0.000000e+00 : f32
    %13 = vector.broadcast %cst_14 : f32 to vector<16x128xf32>
    %14 = arith.maximumf %12, %13 : vector<16x128xf32>
    %15 = arith.truncf %14 : vector<16x128xf32> to vector<16x128xbf16>
    %cst_15 = arith.constant dense<0.000000e+00> : vector<16x128xf32>
    %16 = tpu.matmul %15, %5, %cst_15 {dimension_numbers = #tpu.dot_dimension_numbers<[1], [0], [0], [1], [0, 0, 1, 1], [], []>} : vector<16x128xbf16>, vector<128x128xbf16>, vector<16x128xf32> -> vector<16x128xf32>
    %17 = arith.truncf %16 : vector<16x128xf32> to vector<16x128xbf16>
    %cst_16 = arith.constant dense<0.000000e+00> : vector<16x128xf32>
    %18 = tpu.matmul %1, %17, %cst_16 {dimension_numbers = #tpu.dot_dimension_numbers<[1], [0], [0], [1], [0, 0, 1, 1], [], []>} : vector<16x16xbf16>, vector<16x128xbf16>, vector<16x128xf32> -> vector<16x128xf32>
    %19 = vector.broadcast %7 : vector<1x128xf32> to vector<16x128xf32>
    %20 = arith.addf %18, %19 : vector<16x128xf32>
    %c0_17 = arith.constant 0 : index
    %c0_18 = arith.constant 0 : index
    %c0_19 = arith.constant 0 : index
    %21 = vector.load %arg7[%c0_17, %c0_18, %c0_19] : memref<1x16x128xf32, #tpu.memory_space<vmem>>, vector<1x16x128xf32>
    %22 = vector.shape_cast %21 : vector<1x16x128xf32> to vector<16x128xf32>
    %23 = vector.shape_cast %20 : vector<16x128xf32> to vector<1x16x128xf32>
    tpu.vector_store %arg7[%c0_17, %c0_18, %c0_19], %23 {strides = array<i32>} : memref<1x16x128xf32, #tpu.memory_space<vmem>>, vector<1x16x128xf32>,
    return
  }
  func.func @transform_0(%arg0: i32) -> (i32, i32, i32) {
    %c0_i32 = arith.constant 0 : i32
    %c0_i32_0 = arith.constant 0 : i32
    %c0_i32_1 = arith.constant 0 : i32
    return %arg0, %c0_i32, %c0_i32_0 : i32, i32, i32
  }
  func.func @transform_1(%arg0: i32) -> (i32, i32, i32) {
    %c0_i32 = arith.constant 0 : i32
    %c0_i32_0 = arith.constant 0 : i32
    %c0_i32_1 = arith.constant 0 : i32
    return %arg0, %c0_i32, %c0_i32_0 : i32, i32, i32
  }
  func.func @transform_2(%arg0: i32) -> (i32, i32) {
    %c0_i32 = arith.constant 0 : i32
    %c0_i32_0 = arith.constant 0 : i32
    %c0_i32_1 = arith.constant 0 : i32
    return %c0_i32, %c0_i32_0 : i32, i32
  }
  func.func @transform_3(%arg0: i32) -> (i32, i32) {
    %c0_i32 = arith.constant 0 : i32
    %c0_i32_0 = arith.constant 0 : i32
    %c0_i32_1 = arith.constant 0 : i32
    return %c0_i32, %c0_i32_0 : i32, i32
  }
  func.func @transform_4(%arg0: i32) -> (i32, i32) {
    %c0_i32 = arith.constant 0 : i32
    %c0_i32_0 = arith.constant 0 : i32
    %c0_i32_1 = arith.constant 0 : i32
    return %c0_i32, %c0_i32_0 : i32, i32
  }
  func.func @transform_5(%arg0: i32) -> (i32, i32) {
    %c0_i32 = arith.constant 0 : i32
    %c0_i32_0 = arith.constant 0 : i32
    %c0_i32_1 = arith.constant 0 : i32
    return %c0_i32, %c0_i32_0 : i32, i32
  }
  func.func @transform_6(%arg0: i32) -> (i32, i32, i32) {
    %c0_i32 = arith.constant 0 : i32
    %c0_i32_0 = arith.constant 0 : i32
    %c0_i32_1 = arith.constant 0 : i32
    return %arg0, %c0_i32, %c0_i32_0 : i32, i32, i32
  }
}

</mosaic_0001>

<bundles_post_ra>
// kernel: tpu_custom_call.1
= control target key start
LH: loop header
LB: loop body
LE: loop exit
PB: predicated region body
PF: predicated region fallthrough
CT: control target
= control target key end

     0   :  { %s1329_s0 = inlined_call_operand.hbm [shape: bf16[2,16,16], index: 0, kind: input, shape index: {}]   ;;  %s1330_s1 = inlined_call_operand.hbm [shape: bf16[2,16,128], index: 1, kind: input, shape index: {}]   ;;  %s1331_s2 = inlined_call_operand.hbm [shape: bf16[128,128], index: 2, kind: input, shape index: {}]   ;;  %s1332_s3 = inlined_call_operand.vmem [shape: f32[1,128], index: 3, kind: input, shape index: {}]   ;;  %s1333_s4 = inlined_call_operand.hbm [shape: bf16[128,128], index: 4, kind: input, shape index: {}]   ;;  %s1334_s5 = inlined_call_operand.vmem [shape: f32[1,128], index: 5, kind: input, shape index: {}]   ;;  %s1335_s6 = inlined_call_operand.hbm [shape: f32[2,16,128], index: 6, kind: output, shape index: {}]  }
   0x1   :  { %1341 = sst [smem:[#allocation18_spill]] %s1329_s0 }
   0x2   :  { %1342 = sst [smem:[#allocation19_spill]] %s1331_s2 }
   0x3   :  { %1343 = sst [smem:[#allocation20_spill]] %s1333_s4 }
   0x4   :  { %11 = vsyncpa [#allocation3], 0 }
   0x5   :  { %13 = vsyncpa [#allocation3 + $0x1], 0 }
   0x6   :  { %14 = vsyncpa [#allocation6], 0 }
   0x7   :  { %16 = vsyncpa [#allocation6 + $0x1], 0 }
   0x8   :  { %17 = vsyncpa [#allocation9], 0 }
   0x9   :  { %18 = vsyncpa [#allocation4], 0 }
   0xa   :  { %20 = vsyncpa [#allocation4 + $0x1], 0  ;;  %s1133_s21 = smov 0   ;;  %s1135_s22 = smov 0  }
   0xb   :  { %s1137_s23 = smov 0   ;;  %s1139_s24 = smov 0  }
   0xc LB: > { %1344 = sst [smem:[#allocation16_spill]] %s1086_s23  ;;  %s1154_s25 = sadd.s32 4294967295, %s1090_s24   ;;  %s1090_s24 = sphi %s1139_s24, %s1361_s24   ;;  %s1086_s23 = sphi %s1137_s23, %s1358_s23   ;;  %s1082_s22 = sphi %s1135_s22, %s1360_s22   ;;  %s1078_s21 = sphi %s1133_s21, %s1359_s21  }
   0xd   : > { %s697_s26 = sadd.s32 4294967294, %s1090_s24   ;;  %p46_p0 = scmp.ne.s32.totalorder %s1082_s22, %s1078_s21 }
   0xe   : > { %p47_p1 = scmp.eq.s32.totalorder %s1154_s25, 0  ;;  %p180_p2 = scmp.eq.s32.totalorder %s1154_s25, 1 }
   0xf   : > { %p186_p3 = scmp.eq.s32.totalorder %s697_s26, 1  ;;  %p698_p5 = scmp.ge.s32.totalorder %s1090_s24, 1 }
  0x10   : > { %p1163_p4 = por %p47_p1, %p46_p0  ;;  %p193_p7 = scmp.lt.s32.totalorder %s1090_s24, 3 }
  0x11   : > { %p1168_p6 = por %p186_p3, %p46_p0  ;;  %s1347_s2 = sld [smem:[#allocation19_spill]] }
  0x12   : > { %p1176_p8 = pnand %p698_p5, %p193_p7  ;;  %s1092_s9 = smov [#allocation7]  }
  0x13   : > { %s206_s10 = sshll.u32 %s1092_s9, 4  ;;  %s1349_s4 = sld [smem:[#allocation20_spill]]  ;;  %s207_s10 = int_to_ptr.vmem [resolvable:$true] %s206_s10 }
  0x14   : > { %p828_p9 = pneg %p1176_p8  ;;  %s1336_s14 = smov 64  }
  0x15   : > { %s1338_s15 = smov 4   ;;  %s1095_s16 = smov [#allocation8]  }
  0x16   : > { %p829_p10 = pnand %p828_p9, %p47_p1  ;;  %s223_s17 = sshll.u32 %s1095_s16, 4  ;;  %s224_s17 = int_to_ptr.vmem [resolvable:$true] %s223_s17 }
  0x17   : > { %s204_s7 = sshll.u32 %s1347_s2, 4  ;;  %s1195_s18 = sadd.s32 1, %s1090_s24   ;;  %s205_s7 = int_to_ptr.hbm [resolvable:$true] %s204_s7 }
  0x18   : > { %831 = dma.hbm_to_vmem [thread:$0]  (!%p829_p10), %s205_s7, 1024, %s207_s10, [#allocation6], %s1336_s14, %s1336_s14, %s1338_s15  }
  0x19   : > { %s221_s13 = sshll.u32 %s1349_s4, 4  ;;  %s33_s19 = sadd.s32 1, %s1086_s23  ;;  %s222_s13 = int_to_ptr.hbm [resolvable:$true] %s221_s13 }
  0x1a   : > { %834 = dma.hbm_to_vmem [thread:$0]  (!%p829_p10), %s222_s13, 1024, %s224_s17, [#allocation9], %s1336_s14, %s1336_s14, %s1338_s15  }
  0x1b   : > { %s30_s20 = ssub.s32 %s1090_s24, %s1195_s18  ;;  %p40_p12 = scmp.ne.s32.totalorder %s1086_s23, %s1082_s22 }
  0x1c   : > { %p31_p13 = scmp.eq.s32.totalorder %s30_s20, 0  ;;  %p41_p0 = scmp.eq.s32.totalorder %s1090_s24, 0 }
  0x1d   : > { %p1205_p3 = por %p180_p2, %p40_p12  ;;  %p848_p5 = scmp.lt.s32.totalorder %s1090_s24, 2 }
  0x1e   : > { %s1211_s29 = scalar_select %p31_p13, %s1086_s23, %s33_s19  }
  0x1f   : > { %p42_p7 = por %p41_p0, %p40_p12  ;;  %s240_s30 = sand.u32 1, %s1086_s23  }
  0x20   : > { %1351 = sst [smem:[#allocation17_spill]] %s1211_s29  ;;  %s1214_s7 = sshll.u32 %s240_s30, 3 }
  0x21   : > { %s793_s9 = sshll.u32 %s1090_s24, 3  ;;  %s1352_s0 = sld [smem:[#allocation18_spill]] }
  0x22   : > { %s244_s13 = scalar_lea.vmem [#allocation2], %s1214_s7  ;;  %p1221_p2 = pnand %p848_p5, %p42_p7 }
  0x23   : > { %s252_s16 = sshll.u32 %s244_s13, 4  ;;  %s271_s15 = scalar_lea.hbm %s1330_s1, %s793_s9  ;;  %s253_s16 = int_to_ptr.vmem [resolvable:$true] %s252_s16 }
  0x24   : > { %s272_s2 = sshll.u32 %s271_s15, 4  ;;  %s241_s4 = scalar_lea.sflag [#allocation3], %s240_s30  ;;  %s273_s2 = int_to_ptr.hbm [resolvable:$true] %s272_s2 }
  0x25   : > { %p956_p10 = pneg %p1221_p2 }
  0x27   : > { %s249_s12 = scalar_lea.hbm %s1352_s0, %s793_s9  ;;  %s959_s13 = scalar_lea.hbm %s1352_s0, 16 }
  0x28   : > { %s250_s17 = sshll.u32 %s249_s12, 4  ;;  %s251_s17 = int_to_ptr.hbm [resolvable:$true] %s250_s17 }
  0x29   : > { %s952_s29 = sshra.s32 %s251_s17, 4  ;;  %s953_s29 = int_to_ptr.hbm [resolvable:$true] %s952_s29 }
  0x2a   : > { %s954_s10 = scalar_lea.hbm %s953_s29, 8  ;;  %p960_p0 = scmp.lt.s32.totalorder %s953_s29, %s1352_s0 }
  0x2b   : > { %p955_p9 = scmp.ne.s32.totalorder %s953_s29, %s954_s10  ;;  %p961_p5 = scmp.lt.s32.totalorder %s959_s13, %s954_s10 }
  0x2d   : > { %p957_p12 = pnand %p956_p10, %p955_p9  ;;  %p962_p7 = por %p961_p5, %p960_p0 }
  0x2f   : > { %p958_p13 = pneg %p957_p12 }
  0x31   : > { %p963_p11 = pnand %p962_p7, %p958_p13 }
  0x33   : > { %966 = shalt.err (!%p963_p11)
}
  0x34   : > { %s1354_s15 = smov 4   ;;  %s1355_s30 = smov 64  }
  0x35   : > { %838 = dma.hbm_to_vmem [thread:$0]  (!%p1221_p2), %s251_s17, 128, %s253_s16, %s241_s4, %s1355_s30, %s1355_s30, %s1354_s15  }
  0x36   : > { %s266_s9 = scalar_lea.vmem [#allocation5], %s1214_s7  ;;  %s262_s12 = sand.u32 1, %s1090_s24  }
  0x37   : > { %s274_s11 = sshll.u32 %s266_s9, 4  ;;  %s263_s14 = scalar_lea.sflag [#allocation6], %s262_s12  ;;  %s275_s11 = int_to_ptr.vmem [resolvable:$true] %s274_s11 }
  0x38   : > { %s982_s29 = sshra.s32 %s273_s2, 4  ;;  %s989_s0 = scalar_lea.hbm %s1330_s1, 16  ;;  %s983_s29 = int_to_ptr.hbm [resolvable:$true] %s982_s29 }
  0x39   : > { %s984_s10 = scalar_lea.hbm %s983_s29, 8  ;;  %p990_p13 = scmp.lt.s32.totalorder %s983_s29, %s1330_s1 }
  0x3a   : > { %p985_p9 = scmp.ne.s32.totalorder %s983_s29, %s984_s10  ;;  %p991_p0 = scmp.lt.s32.totalorder %s989_s0, %s984_s10 }
  0x3c   : > { %p987_p11 = pnand %p985_p9, %p956_p10  ;;  %p992_p5 = por %p991_p0, %p990_p13 }
  0x3e   : > { %p988_p12 = pneg %p987_p11 }
  0x40   : > { %p993_p7 = pnand %p992_p5, %p988_p12 }
  0x42   : > { %996 = shalt.err (!%p993_p7)
}
  0x43   : > { %841 = dma.hbm_to_vmem [thread:$0]  (!%p1221_p2), %s273_s2, 128, %s275_s11, %s263_s14, %s1355_s30, %s1355_s30, %s1354_s15  }
  0x44   : > { %286 = sbr.rel (%p1176_p8) target bundleno = 683 (0x2ab), region = 44  ;;  %s1263_s7 = sand.u32 (!%p1176_p8), 1, %s1082_s22  }
  0x45   : > { %s709_s23 = sshll.u32 (!%p1176_p8), %s1263_s7, 3  ;;  %s289_s0 = scalar_lea.sflag (!%p1176_p8), [#allocation3], %s1263_s7 }
  0x46   : > { %s1267_s16 = scalar_lea.vmem (!%p1176_p8), [#allocation2], %s709_s23 }
  0x49   : > { %1057 = dma.done.wait (%p1163_p4), %s289_s0, 128  }
  0x4a   : > { %1059 = vsyncadd (%p1163_p4), %s289_s0, 4294967168  ;;  %s298_s2 = sand.u32 1, %s1154_s25   ;;  %s302_s17 = scalar_lea.vmem [#allocation5], %s709_s23 }
  0x4b   : > { %s299_s8 = scalar_lea.sflag [#allocation6], %s298_s2 }
  0x4c   : > { %1061 = dma.done.wait (%p1163_p4), %s299_s8, 128  }
  0x4d   : > { %1063 = vsyncadd (%p1163_p4), %s299_s8, 4294967168 }
  0x4e   : > { %1065 = dma.done.wait (%p47_p1), [#allocation6], 1024  }
  0x4f   : > { %1067 = vsyncadd (%p47_p1), [#allocation6], 4294966272 }
  0x50   : > { %1069 = dma.done.wait (%p47_p1), [#allocation9], 1024  }
  0x51   : > { %1071 = vsyncadd (%p47_p1), [#allocation9], 4294966272  ;;  %v804_v0 = vld [vmem:[#allocation7 + $0x38] sm:$0xff]  ;;  %v803_v1 = vld [vmem:[#allocation7 + $0x30] sm:$0xff]  ;;  %vm463_vm0 = vcmask 130048   ;;  %s713_s15 = sshll.u32 %s1263_s7, 4 }
  0x52   : > { %440 = vmatpush.bf16.msra.mxu0 %v804_v0  ;;  %v802_v2 = vld [vmem:[#allocation7 + $0x28] sm:$0xff]  ;;  %v801_v3 = vld [vmem:[#allocation7 + $0x20] sm:$0xff]  ;;  %v800_v4 = vld [vmem:[#allocation7 + $0x18] sm:$0xff]  ;;  %s813_s11 = sshll.u32 %s1154_s25, 4  ;;  %s346_s10 = scalar_lea.vmem [#allocation10], %s713_s15 }
  0x53   : > { %v799_v5 = vld [vmem:[#allocation7 + $0x10] sm:$0xff]  ;;  %v798_v6 = vld [vmem:[#allocation7 + $0x8] sm:$0xff]  ;;  %v797_v7 = vld [vmem:[#allocation7] sm:$0xff]  ;;  %s578_s29 = scalar_lea.hbm %s1335_s6, %s813_s11  ;;  %s579_s13 = sshll.u32 %s346_s10, 4  ;;  %s580_s13 = int_to_ptr.vmem [resolvable:$true] %s579_s13 }
  0x54   : > { %v796_v8 = vld [vmem:[%s302_s17] sm:$0xff]  ;;  %v810_v11 = vld [vmem:[#allocation8 + $0x28] sm:$0xff]  ;;  %v809_v12 = vld [vmem:[#allocation8 + $0x20] sm:$0xff]  ;;  %s581_s19 = sshll.u32 %s578_s29, 4  ;;  %s567_s4 = scalar_lea.sflag [#allocation4], %s1263_s7  ;;  %s582_s19 = int_to_ptr.hbm [resolvable:$true] %s581_s19 }
  0x55   : > { %v812_v9 = vld [vmem:[#allocation8 + $0x38] sm:$0xff]  ;;  %v811_v10 = vld [vmem:[#allocation8 + $0x30] sm:$0xff]  ;;  %v795_v16 = vld [vmem:[%s1267_s16] sm:$0xff]  ;;  %s1026_s23 = sshra.s32 %s582_s19, 4  ;;  %s1032_s2 = scalar_lea.hbm %s1335_s6, 32  ;;  %s1027_s23 = int_to_ptr.hbm [resolvable:$true] %s1026_s23 }
  0x56   : > { %441 = vmatpush.bf16.msra.mxu0 %v803_v1  ;;  %532 = vmatpush.bf16.msra.mxu2 %v812_v9  ;;  %v808_v17 = vld [vmem:[#allocation8 + $0x18] sm:$0xff]  ;;  %v807_v18 = vld [vmem:[#allocation8 + $0x10] sm:$0xff]  ;;  %v806_v19 = vld [vmem:[#allocation8 + $0x8] sm:$0xff]  ;;  %s1028_s25 = scalar_lea.hbm %s1027_s23, 16  ;;  %p1033_p2 = scmp.lt.s32.totalorder %s1027_s23, %s1335_s6 }
  0x57   : > { %v805_v20 = vld [vmem:[#allocation8] sm:$0xff]  ;;  %p1029_p1 = scmp.ne.s32.totalorder %s1027_s23, %s1028_s25  ;;  %p1034_p10 = scmp.lt.s32.totalorder %s1032_s2, %s1028_s25 }
  0x58   : > { %v890_v22 = vld [vmem:[%s1332_s3] ss:$0 sm:$0xff] }
  0x59   : > { %v891_v32 = vld [vmem:[%s1334_s5] ss:$0 sm:$0xff]  ;;  %p1030_p4 = pnand %p1029_p1, %p1205_p3  ;;  %p1035_p9 = por %p1034_p10, %p1033_p2 }
  0x5a   : > { %442 = vmatpush.bf16.msra.mxu0 %v802_v2  ;;  %533 = vmatpush.bf16.msra.mxu2 %v811_v10 }
  0x5b   : > { %p1031_p8 = pneg %p1030_p4 }
  0x5d   : > { %p1036_p11 = pnand %p1035_p9, %p1031_p8 }
  0x5e   : > { %443 = vmatpush.bf16.msra.mxu0 %v801_v3  ;;  %534 = vmatpush.bf16.msra.mxu2 %v810_v11 }
  0x62   : > { %444 = vmatpush.bf16.msra.mxu0 %v800_v4  ;;  %535 = vmatpush.bf16.msra.mxu2 %v809_v12 }
  0x66   : > { %445 = vmatpush.bf16.msra.mxu0 %v799_v5  ;;  %536 = vmatpush.bf16.msra.mxu2 %v808_v17 }
  0x6a   : > { %446 = vmatpush.bf16.msra.mxu0 %v798_v6  ;;  %537 = vmatpush.bf16.msra.mxu2 %v807_v18 }
  0x6e   : > { %447 = vmatpush.bf16.msra.mxu0 %v797_v7  ;;  %538 = vmatpush.bf16.msra.mxu2 %v806_v19 }
  0x71   : > { %448 = vmatmul.bf16.vlgmr.msra.gmra.mxu0 %v796_v8 }
  0x72   : > { %539 = vmatpush.bf16.msra.mxu2 %v805_v20 }
  0xee   : > { %v449_v13 = vpop.f32.mrf.mxu0 }
  0xf6   : > { %v451_v14 = vpop.f32.mrf.mxu0 }
  0xf7   : > { %v454_v15 = vpack.c.bf16 %v451_v14, %v449_v13 }
  0xf9   : > { %474 = vmatpush.bf16.msra.mxu1 %v454_v15 }
  0xfc   : > { %754 = vmatmul.msk.bf16.vlgmr.msra.gmra.mxu1 %vm463_vm0, %v795_v16 }
 0x179   : > { %v476_v21 = vpop.f32.mrf.mxu1 }
 0x17a   : > { %v477_v23 = vadd.f32 %v890_v22, %v476_v21 }
 0x17c   : > { %v481_v26 = vmax.f32 %v477_v23, 0.0 }
 0x181   : > { %v478_v24 = vpop.f32.mrf.mxu1 }
 0x182   : > { %v479_v25 = vadd.f32 %v890_v22, %v478_v24 }
 0x184   : > { %v482_v27 = vmax.f32 %v479_v25, 0.0 }
 0x186   : > { %v483_v28 = vpack.c.bf16 %v482_v27, %v481_v26 }
 0x188   : > { %540 = vmatmul.bf16.vlgmr.msra.gmra.mxu2 %v483_v28 }
 0x20b   : > { %v541_v29 = vpop.f32.mrf.mxu2 }
 0x213   : > { %v543_v30 = vpop.f32.mrf.mxu2 }
 0x214   : > { %v546_v31 = vpack.c.bf16 %v543_v30, %v541_v29 }
 0x216   : > { %557 = vmatpush.bf16.msra.mxu3 %v546_v31 }
 0x219   : > { %787 = vmatmul.msk.bf16.vlgmr.msra.gmra.mxu3 %vm463_vm0, %v795_v16 }
 0x29c   : > { %v559_v33 = vpop.f32.mrf.mxu3 }
 0x29d   : > { %v560_v34 = vadd.f32 %v891_v32, %v559_v33 }
 0x29f   : > { %564 = vst [vmem:[%s346_s10] sm:$0xff] %v560_v34 }
 0x2a4   : > { %v561_v35 = vpop.f32.mrf.mxu3 }
 0x2a5   : > { %v562_v36 = vadd.f32 %v891_v32, %v561_v35 }
 0x2a7   : > { %565 = vst [vmem:[%s346_s10 + $0x8] sm:$0xff] %v562_v36 }
 0x2a8   : > { %1039 = shalt.err (!%p1036_p11)
}
 0x2a9   : > { %s1096_s7 = smov 128   ;;  %s1097_s27 = smov 8  }
 0x2aa   : > { %826 = dma.vmem_to_hbm [thread:$0]  (%p1205_p3), %s580_s13, 256, %s582_s19, %s567_s4, %s1096_s7, %s1096_s7, %s1097_s27  }
 0x2ab PF: > { %s596_s20 = sand.u32 1, %s1078_s21   ;;  %p1356_p12 = scmp.ge.s32.totalorder %s1090_s24, 2 }
 0x2ac   : > { %s597_s15 = scalar_lea.sflag [#allocation4], %s596_s20 }
 0x2ad   : > { %p843_p13 = pnand %p1356_p12, %p1168_p6 }
 0x2af   : > { %p844_p0 = pneg %p843_p13 }
 0x2b1   : > { %1073 = dma.done.wait (%p844_p0), %s597_s15, 256  }
 0x2b2   : > { %1075 = vsyncadd (%p844_p0), %s597_s15, 4294967040  ;;  %s1357_s30 = sld [smem:[#allocation16_spill]]  ;;  %p23_p5 = scmp.ge.s32.totalorder %s1195_s18, 4  }
 0x2b3   : > { %s1358_s23 = sld [smem:[#allocation17_spill]]  ;;  %s1359_s21 = smov %s1082_s22 }
 0x2b4   : > { %s1361_s24 = smov %s1195_s18  ;;  %25 = sbr.rel (!%p23_p5) target bundleno = 12 (0xc), region = 110 }
 0x2b8   : > { %s1360_s22 = smov %s1357_s30 }
 0x2b9   :  { %603 = vsyncpa [#allocation3], 1 }
 0x2ba   :  { %605 = vsyncpa [#allocation3 + $0x1], 1 }
 0x2bb   :  { %606 = vsyncpa [#allocation6], 1 }
 0x2bc   :  { %608 = vsyncpa [#allocation6 + $0x1], 1 }
 0x2bd   :  { %609 = vsyncpa [#allocation9], 1 }
 0x2be   :  { %610 = vsyncpa [#allocation4], 1 }
 0x2bf   :  { %612 = vsyncpa [#allocation4 + $0x1], 1 }

</bundles_post_ra>
